<compile_context>
chip_gen: v6e
topology: v6e:2x2x1
jax: 0.10.0
libtpu: 0.0.40
codegen_flags: <defaults>
</compile_context>

<pallas_src>
import jax
import jax.numpy as jnp
from jax.experimental import pallas as pl
from jax.experimental.pallas import tpu as pltpu


_LANE = 128      # TPU lane width: batch tiles must be a multiple of this.
_TB_MAX = 8192   # rows (lanes) per grid step; 5*8192*4B = 160 KiB per buffer.


def _round_up(n, m):
    return ((n + m - 1) // m) * m


def fused_mlp_kernel(xT_ref, wT_ref, bT_ref, oT_ref):
    # xT_ref: (5, TB) f32, batch on lanes.  wT_ref: (5, 5) = (w1 @ w2)^T.
    # bT_ref: (5, 1) = (b1 @ w2 + b2)^T.    yT = W^T @ xT + b^T.
    # The kernel is HBM-bound after fusion; the tiny dot hides under the DMA.
    yT = jnp.dot(wT_ref[...], xT_ref[...], preferred_element_type=jnp.float32)
    oT_ref[...] = (yT + bT_ref[...]).astype(oT_ref.dtype)


@jax.jit
def mymodel_forward(x, w1, b1, w2, b2):
    """x: (B, 5) float32 -> (B, 5) float32. Equivalent to linear2(linear(x))."""
    B, f_in = x.shape
    # --- algebraic fusion of the two linears (identical math, new rounding) ---
    w_fused = w1 @ w2                      # (5, 5)
    b_fused = b1 @ w2 + b2                 # (1, 5)
    f_out = w_fused.shape[1]

    # --- lane-dense layout: batch on the lane axis, padded to the tile size ---
    tb = min(_TB_MAX, _round_up(B, _LANE))
    b_pad = _round_up(B, tb)
    xT = jnp.pad(x.T, ((0, 0), (0, b_pad - B)))   # (5, Bp), zeros in pad region
    wT = w_fused.T                                # (5, 5)
    bT = b_fused.T                                # (5, 1)

    yT = pl.pallas_call(
        fused_mlp_kernel,
        out_shape=jax.ShapeDtypeStruct((f_out, b_pad), x.dtype),
        grid=(b_pad // tb,),
        in_specs=[
            pl.BlockSpec((f_in, tb), lambda i: (0, i)),     # streamed batch tile
            pl.BlockSpec((f_in, f_out), lambda i: (0, 0)),  # resident fused weight
            pl.BlockSpec((f_out, 1), lambda i: (0, 0)),     # resident fused bias
        ],
        out_specs=pl.BlockSpec((f_out, tb), lambda i: (0, i)),
        compiler_params=pltpu.CompilerParams(
            dimension_semantics=("parallel",)),
    )(xT, wT, bT)

    return yT[:, :B].T                            # back to (B, 5)


def init_params(key):
    """Deterministic init mimicking torch.nn.Linear (uniform +-1/sqrt(fan_in))."""
    k1, k2, k3, k4 = jax.random.split(key, 4)
    in1, out1 = 5, 80
    in2, out2 = 80, 5
    bound1 = 1.0 / jnp.sqrt(jnp.float32(in1))
    bound2 = 1.0 / jnp.sqrt(jnp.float32(in2))
    # Stored already transposed relative to torch: (in, out)
    w1 = jax.random.uniform(k1, (in1, out1), jnp.float32, -bound1, bound1)
    b1 = jax.random.uniform(k2, (1, out1), jnp.float32, -bound1, bound1)
    w2 = jax.random.uniform(k3, (in2, out2), jnp.float32, -bound2, bound2)
    b2 = jax.random.uniform(k4, (1, out2), jnp.float32, -bound2, bound2)
    return w1, b1, w2, b2


if __name__ == "__main__":
    key = jax.random.PRNGKey(0)
    kx, kp = jax.random.split(key)
    B = 8
    x = jax.random.normal(kx, (B, 5), jnp.float32)
    w1, b1, w2, b2 = init_params(kp)

    out = jax.block_until_ready(mymodel_forward(x, w1, b1, w2, b2))

    # Reference in plain JAX (same math as the PyTorch module, unfused order).
    ref = (x @ w1 + b1) @ w2 + b2
    assert out.shape == (B, 5)
    assert jnp.allclose(out, ref, atol=1e-5, rtol=1e-5), float(
        jnp.max(jnp.abs(out - ref)))

    print("KERNEL_OK")
</pallas_src>

<mosaic_0001>
module attributes {stable_mosaic.version = 11 : i64} {
  func.func @fused_mlp_kernel(%arg0: i32, %arg1: memref<5x128xf32, #tpu.memory_space<vmem>>, %arg2: memref<5x5xf32, #tpu.memory_space<vmem>>, %arg3: memref<5x1xf32, #tpu.memory_space<vmem>>, %arg4: memref<5x128xf32, #tpu.memory_space<vmem>>) attributes {dimension_semantics = [#tpu.dimension_semantics<parallel>], iteration_bounds = array<i64: 1>, scalar_prefetch = 0 : i64, scratch_operands = 0 : i64, tpu.core_type = #tpu.core_type<tc>, window_params = [{transform_indices = @transform_0, window_bounds = array<i64: 5, 128>}, {pipeline_mode = #tpu.pipeline_mode<synchronous>, transform_indices = @transform_1, window_bounds = array<i64: 5, 5>}, {pipeline_mode = #tpu.pipeline_mode<synchronous>, transform_indices = @transform_2, window_bounds = array<i64: 5, 1>}, {transform_indices = @transform_3, window_bounds = array<i64: 5, 128>}]} {
    %c0 = arith.constant 0 : index
    %c0_0 = arith.constant 0 : index
    %0 = vector.load %arg2[%c0, %c0_0] : memref<5x5xf32, #tpu.memory_space<vmem>>, vector<5x5xf32>
    %c0_1 = arith.constant 0 : index
    %c0_2 = arith.constant 0 : index
    %1 = vector.load %arg1[%c0_1, %c0_2] : memref<5x128xf32, #tpu.memory_space<vmem>>, vector<5x128xf32>
    %cst = arith.constant dense<0.000000e+00> : vector<5x128xf32>
    %2 = tpu.matmul %0, %1, %cst {dimension_numbers = #tpu.dot_dimension_numbers<[1], [0], [0], [1], [0, 0, 1, 1], [], []>} : vector<5x5xf32>, vector<5x128xf32>, vector<5x128xf32> -> vector<5x128xf32>
    %c0_3 = arith.constant 0 : index
    %c0_4 = arith.constant 0 : index
    %3 = vector.load %arg3[%c0_3, %c0_4] : memref<5x1xf32, #tpu.memory_space<vmem>>, vector<5x1xf32>
    %4 = vector.broadcast %3 : vector<5x1xf32> to vector<5x128xf32>
    %5 = arith.addf %2, %4 : vector<5x128xf32>
    %c0_5 = arith.constant 0 : index
    %c0_6 = arith.constant 0 : index
    %6 = vector.load %arg4[%c0_5, %c0_6] : memref<5x128xf32, #tpu.memory_space<vmem>>, vector<5x128xf32>
    tpu.vector_store %arg4[%c0_5, %c0_6], %5 {strides = array<i32>} : memref<5x128xf32, #tpu.memory_space<vmem>>, vector<5x128xf32>,
    return
  }
  func.func @transform_0(%arg0: i32) -> (i32, i32) {
    %c0_i32 = arith.constant 0 : i32
    %c0_i32_0 = arith.constant 0 : i32
    return %c0_i32, %arg0 : i32, i32
  }
  func.func @transform_1(%arg0: i32) -> (i32, i32) {
    %c0_i32 = arith.constant 0 : i32
    %c0_i32_0 = arith.constant 0 : i32
    %c0_i32_1 = arith.constant 0 : i32
    return %c0_i32, %c0_i32_0 : i32, i32
  }
  func.func @transform_2(%arg0: i32) -> (i32, i32) {
    %c0_i32 = arith.constant 0 : i32
    %c0_i32_0 = arith.constant 0 : i32
    %c0_i32_1 = arith.constant 0 : i32
    return %c0_i32, %c0_i32_0 : i32, i32
  }
  func.func @transform_3(%arg0: i32) -> (i32, i32) {
    %c0_i32 = arith.constant 0 : i32
    %c0_i32_0 = arith.constant 0 : i32
    return %c0_i32, %arg0 : i32, i32
  }
}

</mosaic_0001>

<bundles_post_ra>
// kernel: mymodel_forward.1
= control target key start
LH: loop header
LB: loop body
LE: loop exit
PB: predicated region body
PF: predicated region fallthrough
CT: control target
= control target key end

     0   :  { %vm26_vm0 = vcmask 1044480   ;;  %vm22_vm1 = vcmask 39936   ;;  %v118_v0 = vmov 0.0   ;;  %vm119_vm2 = vmmov 0   ;;  %s153_s0 = inlined_call_operand.vmem [shape: f32[5,128], index: 0, kind: input, shape index: {}]   ;;  %s154_s1 = inlined_call_operand.vmem [shape: f32[5,5], index: 1, kind: input, shape index: {}]   ;;  %s155_s2 = inlined_call_operand.vmem [shape: f32[5,1], index: 2, kind: input, shape index: {}]   ;;  %s156_s3 = inlined_call_operand.vmem [shape: f32[5,128], index: 3, kind: output, shape index: {}]  }
   0x1   :  { %109 = vmatprep.subr.mxu0 %v118_v0  ;;  %v15_v1 = vld [vmem:[%s153_s0] sm:$0x1f]  ;;  %111 = vmatprep.mubr.msk.f32.mxu0 %vm119_vm2, %v118_v0  ;;  %v120_v3 = vmov 0  }
   0x2   :  { %v14_v2 = vld [vmem:[%s154_s1] sm:$0x1f]  ;;  %110 = vmatpush3.msk.msra.mxu0 %vm26_vm0, %v15_v1  ;;  %117 = vset.pattern.permute.xlu0 %v120_v3 }
   0x3   :  { %v16_v4 = vld [vmem:[%s155_s2] sm:$0x1f]  ;;  %112 = vmatmul.mubr.msk.f32.vlgmr.msra.gmra.mxu0 %vm22_vm1, %v14_v2 }
   0x4   :  { %19 = vperm.xlu0 %117, %v16_v4  }
  0x7f   :  { %v20_v5 = vpop.permute.xlu0 %19 }
  0xc3   :  { %v96_v6 = vpop.f32.mrf.mxu0 }
  0xc4   :  { %v97_v7 = vadd.f32 %v96_v6, %v20_v5 }
  0xc5   :  { %v113_v8 = vpop.f32.mrf.mxu0 }
  0xc6   :  { %100 = vst [vmem:[%s156_s3] sm:$0x1f] %v97_v7 }

</bundles_post_ra>
